<compile_context>
chip_gen: v7x
topology: tpu7x:2x2x1
jax: 0.10.0
libtpu: 0.0.40
codegen_flags: <defaults>
</compile_context>

<pallas_src>
import functools

import jax
import jax.numpy as jnp
import numpy as np
from jax.experimental import pallas as pl
from jax.experimental.pallas import tpu as pltpu

COMPUTE_DTYPE = jnp.bfloat16


def _round_up(x, m):
    return ((x + m - 1) // m) * m


# --------------------------------------------------------------------------
# Kernel: fused Linear->ReLU->Linear->ReLU->(mu||logvar) for one batch tile.
# --------------------------------------------------------------------------
def encoder_kernel(x_ref, w1_ref, b1_ref, w2_ref, b2_ref, wh_ref, bh_ref,
                   mu_ref, lv_ref):
    latent = mu_ref.shape[-1]
    # x arrives in its HBM dtype (f32); cast to the MXU compute dtype in VMEM.
    x = x_ref[...].astype(w1_ref.dtype)                        # (TB, K)
    h = jnp.dot(x, w1_ref[...],
                preferred_element_type=jnp.float32) + b1_ref[...]
    h = jnp.maximum(h, 0.0)                                    # (TB, H) f32
    h = jnp.dot(h.astype(w2_ref.dtype), w2_ref[...],
                preferred_element_type=jnp.float32) + b2_ref[...]
    h = jnp.maximum(h, 0.0)                                    # (TB, H) f32
    # Fused heads: one dot produces [mu || logvar]; split only at the store.
    slab = (jnp.dot(h.astype(wh_ref.dtype), wh_ref[...],
                    preferred_element_type=jnp.float32)
            + bh_ref[...])                                     # (TB, 2L) f32
    mu_ref[...] = slab[:, :latent].astype(mu_ref.dtype)
    lv_ref[...] = slab[:, latent:].astype(lv_ref.dtype)


# --------------------------------------------------------------------------
# pallas_call builder.
# --------------------------------------------------------------------------
def _vmem_limit_bytes(tb, in_dim, hidden, latent, params, dbl_weights):
    wbytes = sum(int(p.size) * p.dtype.itemsize for p in params)
    if dbl_weights:
        wbytes *= 2
    x_t = 2 * tb * in_dim * 4                     # double-buffered x tile
    o_t = 2 * 2 * tb * latent * 4                 # double-buffered mu/lv tiles
    h_t = 3 * tb * max(hidden, 2 * latent) * 4    # f32 intermediates
    est = wbytes + x_t + o_t + h_t + (2 << 20)
    return int(min(max(est, 32 << 20), 96 << 20))


def _encoder_call(x, params, *, latent, tb, grid_b, single_buffer_weights):
    w1, b1, w2, b2, wh, bh = params
    B, in_dim = x.shape
    hidden = w1.shape[1]

    mode = pl.Buffered(1) if single_buffer_weights else None

    def resident(shape):
        # Grid-invariant (weights/biases): constant index_map -> fetched once.
        if mode is None:
            return pl.BlockSpec(shape, lambda i: (0, 0))
        return pl.BlockSpec(shape, lambda i: (0, 0), pipeline_mode=mode)

    vmem_limit = _vmem_limit_bytes(tb, in_dim, hidden, latent, params,
                                   dbl_weights=not single_buffer_weights)

    return pl.pallas_call(
        encoder_kernel,
        out_shape=(jax.ShapeDtypeStruct((B, latent), jnp.float32),
                   jax.ShapeDtypeStruct((B, latent), jnp.float32)),
        grid=(grid_b,),
        in_specs=[
            pl.BlockSpec((tb, in_dim), lambda i: (i, 0)),      # x: batch-tiled
            resident(w1.shape), resident(b1.shape),
            resident(w2.shape), resident(b2.shape),
            resident(wh.shape), resident(bh.shape),
        ],
        out_specs=(pl.BlockSpec((tb, latent), lambda i: (i, 0)),
                   pl.BlockSpec((tb, latent), lambda i: (i, 0))),
        compiler_params=pltpu.CompilerParams(
            dimension_semantics=("parallel",),                 # v7x: 2 TCs
            vmem_limit_bytes=vmem_limit),
    )(x, w1, b1, w2, b2, wh, bh)


def encoder_forward(x, packed_params, *, latent, tile_b=512):
    """forward(x) -> (mu, logvar), each (B, latent) float32."""
    B, _ = x.shape

    # Adaptive batch tile: near-equal tiles (multiples of 8 sublanes), capped
    # at tile_b, and >= 2 grid steps when possible so both v7x cores work.
    B8 = _round_up(B, 8)
    tb = max(8, _round_up(min(tile_b, B8), 8))
    n = pl.cdiv(B8, tb)
    if n < 2 and B8 >= 16:
        n = 2
    tb = _round_up(pl.cdiv(B8, n), 8)
    grid_b = pl.cdiv(B, tb)            # ragged last tile masked by Pallas

    try:
        return _encoder_call(x, packed_params, latent=latent, tb=tb,
                             grid_b=grid_b, single_buffer_weights=True)
    except Exception:
        # pl.Buffered single-buffering unsupported on this build -> default
        # double-buffered weights (same numerics, more VMEM).
        return _encoder_call(x, packed_params, latent=latent, tb=tb,
                             grid_b=grid_b, single_buffer_weights=False)


# --------------------------------------------------------------------------
# Parameter construction (PyTorch-style init) + head fusion / dtype packing.
# --------------------------------------------------------------------------
def init_linear(key, fan_in, fan_out):
    """PyTorch Linear init (uniform +-1/sqrt(fan_in)); W stored as (in, out)."""
    kw, kb = jax.random.split(key)
    bound = 1.0 / np.sqrt(fan_in)
    w = jax.random.uniform(kw, (fan_in, fan_out), jnp.float32, -bound, bound)
    b = jax.random.uniform(kb, (1, fan_out), jnp.float32, -bound, bound)
    return w, b


def build_params(key, in_dim, hidden, latent, *, compute_dtype=COMPUTE_DTYPE):
    k1, k2, k3 = jax.random.split(key, 3)
    w1, b1 = init_linear(k1, in_dim, hidden)
    w2, b2 = init_linear(k2, hidden, hidden)
    wmu, bmu = init_linear(k3, hidden, latent)
    wlv, blv = wmu, bmu              # copy.deepcopy(layers[-1]) => same init

    packed = (
        w1.astype(compute_dtype), b1,                       # biases stay f32
        w2.astype(compute_dtype), b2,
        jnp.concatenate([wmu, wlv], axis=1).astype(compute_dtype),
        jnp.concatenate([bmu, blv], axis=1),
    )
    raw = (w1, b1, w2, b2, wmu, bmu, wlv, blv)
    return packed, raw


# --------------------------------------------------------------------------
# Pure-JAX reference mirroring the kernel numerics (bf16 operands, f32 acc).
# --------------------------------------------------------------------------
def reference_forward(x, raw_params, compute_dtype=COMPUTE_DTYPE):
    w1, b1, w2, b2, wmu, bmu, wlv, blv = raw_params
    q = lambda a: a.astype(compute_dtype).astype(jnp.float32)
    dot = functools.partial(jnp.dot, precision=jax.lax.Precision.HIGHEST)
    h = jnp.maximum(dot(q(x), q(w1)) + b1, 0.0)
    h = jnp.maximum(dot(q(h), q(w2)) + b2, 0.0)
    hq = q(h)
    return dot(hq, q(wmu)) + bmu, dot(hq, q(wlv)) + blv


if __name__ == "__main__":
    batch, in_dim, hidden, latent = 8, 32, 64, 16

    root = jax.random.PRNGKey(0)
    k_x, k_p = jax.random.split(root)
    x = jax.random.normal(k_x, (batch, in_dim), jnp.float32)

    packed, raw = build_params(k_p, in_dim, hidden, latent)

    mu, logvar = encoder_forward(x, packed, latent=latent)
    jax.block_until_ready((mu, logvar))

    mu_ref, lv_ref = reference_forward(x, raw)
    assert mu.shape == (batch, latent) and logvar.shape == (batch, latent)
    np.testing.assert_allclose(np.asarray(mu), np.asarray(mu_ref),
                               rtol=1e-4, atol=1e-4)
    np.testing.assert_allclose(np.asarray(logvar), np.asarray(lv_ref),
                               rtol=1e-4, atol=1e-4)

    print("KERNEL_OK")
</pallas_src>

<mosaic_0001>
module attributes {stable_mosaic.version = 11 : i64} {
  func.func @encoder_kernel(%arg0: i32, %arg1: memref<8x32xf32, #tpu.memory_space<vmem>>, %arg2: memref<32x64xbf16, #tpu.memory_space<vmem>>, %arg3: memref<1x64xf32, #tpu.memory_space<vmem>>, %arg4: memref<64x64xbf16, #tpu.memory_space<vmem>>, %arg5: memref<1x64xf32, #tpu.memory_space<vmem>>, %arg6: memref<64x32xbf16, #tpu.memory_space<vmem>>, %arg7: memref<1x32xf32, #tpu.memory_space<vmem>>, %arg8: memref<8x16xf32, #tpu.memory_space<vmem>>, %arg9: memref<8x16xf32, #tpu.memory_space<vmem>>) attributes {dimension_semantics = [#tpu.dimension_semantics<parallel>], iteration_bounds = array<i64: 1>, scalar_prefetch = 0 : i64, scratch_operands = 0 : i64, tpu.core_type = #tpu.core_type<tc>, window_params = [{transform_indices = @transform_0, window_bounds = array<i64: 8, 32>}, {pipeline_mode = #tpu.pipeline_mode<synchronous>, transform_indices = @transform_1, window_bounds = array<i64: 32, 64>}, {pipeline_mode = #tpu.pipeline_mode<synchronous>, transform_indices = @transform_2, window_bounds = array<i64: 1, 64>}, {pipeline_mode = #tpu.pipeline_mode<synchronous>, transform_indices = @transform_3, window_bounds = array<i64: 64, 64>}, {pipeline_mode = #tpu.pipeline_mode<synchronous>, transform_indices = @transform_4, window_bounds = array<i64: 1, 64>}, {pipeline_mode = #tpu.pipeline_mode<synchronous>, transform_indices = @transform_5, window_bounds = array<i64: 64, 32>}, {pipeline_mode = #tpu.pipeline_mode<synchronous>, transform_indices = @transform_6, window_bounds = array<i64: 1, 32>}, {transform_indices = @transform_7, window_bounds = array<i64: 8, 16>}, {transform_indices = @transform_8, window_bounds = array<i64: 8, 16>}]} {
    %c0 = arith.constant 0 : index
    %c0_0 = arith.constant 0 : index
    %0 = vector.load %arg1[%c0, %c0_0] : memref<8x32xf32, #tpu.memory_space<vmem>>, vector<8x32xf32>
    %1 = arith.truncf %0 : vector<8x32xf32> to vector<8x32xbf16>
    %c0_1 = arith.constant 0 : index
    %c0_2 = arith.constant 0 : index
    %2 = vector.load %arg2[%c0_1, %c0_2] : memref<32x64xbf16, #tpu.memory_space<vmem>>, vector<32x64xbf16>
    %cst = arith.constant dense<0.000000e+00> : vector<8x64xf32>
    %3 = tpu.matmul %1, %2, %cst {dimension_numbers = #tpu.dot_dimension_numbers<[1], [0], [0], [1], [0, 0, 1, 1], [], []>} : vector<8x32xbf16>, vector<32x64xbf16>, vector<8x64xf32> -> vector<8x64xf32>
    %c0_3 = arith.constant 0 : index
    %c0_4 = arith.constant 0 : index
    %4 = vector.load %arg3[%c0_3, %c0_4] : memref<1x64xf32, #tpu.memory_space<vmem>>, vector<1x64xf32>
    %5 = vector.broadcast %4 : vector<1x64xf32> to vector<8x64xf32>
    %6 = arith.addf %3, %5 : vector<8x64xf32>
    %cst_5 = arith.constant 0.000000e+00 : f32
    %7 = vector.broadcast %cst_5 : f32 to vector<8x64xf32>
    %8 = arith.maximumf %6, %7 : vector<8x64xf32>
    %9 = arith.truncf %8 : vector<8x64xf32> to vector<8x64xbf16>
    %c0_6 = arith.constant 0 : index
    %c0_7 = arith.constant 0 : index
    %10 = vector.load %arg4[%c0_6, %c0_7] : memref<64x64xbf16, #tpu.memory_space<vmem>>, vector<64x64xbf16>
    %cst_8 = arith.constant dense<0.000000e+00> : vector<8x64xf32>
    %11 = tpu.matmul %9, %10, %cst_8 {dimension_numbers = #tpu.dot_dimension_numbers<[1], [0], [0], [1], [0, 0, 1, 1], [], []>} : vector<8x64xbf16>, vector<64x64xbf16>, vector<8x64xf32> -> vector<8x64xf32>
    %c0_9 = arith.constant 0 : index
    %c0_10 = arith.constant 0 : index
    %12 = vector.load %arg5[%c0_9, %c0_10] : memref<1x64xf32, #tpu.memory_space<vmem>>, vector<1x64xf32>
    %13 = vector.broadcast %12 : vector<1x64xf32> to vector<8x64xf32>
    %14 = arith.addf %11, %13 : vector<8x64xf32>
    %cst_11 = arith.constant 0.000000e+00 : f32
    %15 = vector.broadcast %cst_11 : f32 to vector<8x64xf32>
    %16 = arith.maximumf %14, %15 : vector<8x64xf32>
    %17 = arith.truncf %16 : vector<8x64xf32> to vector<8x64xbf16>
    %c0_12 = arith.constant 0 : index
    %c0_13 = arith.constant 0 : index
    %18 = vector.load %arg6[%c0_12, %c0_13] : memref<64x32xbf16, #tpu.memory_space<vmem>>, vector<64x32xbf16>
    %cst_14 = arith.constant dense<0.000000e+00> : vector<8x32xf32>
    %19 = tpu.matmul %17, %18, %cst_14 {dimension_numbers = #tpu.dot_dimension_numbers<[1], [0], [0], [1], [0, 0, 1, 1], [], []>} : vector<8x64xbf16>, vector<64x32xbf16>, vector<8x32xf32> -> vector<8x32xf32>
    %c0_15 = arith.constant 0 : index
    %c0_16 = arith.constant 0 : index
    %20 = vector.load %arg7[%c0_15, %c0_16] : memref<1x32xf32, #tpu.memory_space<vmem>>, vector<1x32xf32>
    %21 = vector.broadcast %20 : vector<1x32xf32> to vector<8x32xf32>
    %22 = arith.addf %19, %21 : vector<8x32xf32>
    %23 = vector.extract_strided_slice %22 {offsets = [0, 0], sizes = [8, 16], strides = [1, 1]} : vector<8x32xf32> to vector<8x16xf32>
    %c0_17 = arith.constant 0 : index
    %c0_18 = arith.constant 0 : index
    %24 = vector.load %arg8[%c0_17, %c0_18] : memref<8x16xf32, #tpu.memory_space<vmem>>, vector<8x16xf32>
    tpu.vector_store %arg8[%c0_17, %c0_18], %23 {strides = array<i32>} : memref<8x16xf32, #tpu.memory_space<vmem>>, vector<8x16xf32>,
    %25 = vector.extract_strided_slice %22 {offsets = [0, 16], sizes = [8, 16], strides = [1, 1]} : vector<8x32xf32> to vector<8x16xf32>
    %c0_19 = arith.constant 0 : index
    %c0_20 = arith.constant 0 : index
    %26 = vector.load %arg9[%c0_19, %c0_20] : memref<8x16xf32, #tpu.memory_space<vmem>>, vector<8x16xf32>
    tpu.vector_store %arg9[%c0_19, %c0_20], %25 {strides = array<i32>} : memref<8x16xf32, #tpu.memory_space<vmem>>, vector<8x16xf32>,
    return
  }
  func.func @transform_0(%arg0: i32) -> (i32, i32) {
    %c0_i32 = arith.constant 0 : i32
    %c0_i32_0 = arith.constant 0 : i32
    return %arg0, %c0_i32 : i32, i32
  }
  func.func @transform_1(%arg0: i32) -> (i32, i32) {
    %c0_i32 = arith.constant 0 : i32
    %c0_i32_0 = arith.constant 0 : i32
    %c0_i32_1 = arith.constant 0 : i32
    return %c0_i32, %c0_i32_0 : i32, i32
  }
  func.func @transform_2(%arg0: i32) -> (i32, i32) {
    %c0_i32 = arith.constant 0 : i32
    %c0_i32_0 = arith.constant 0 : i32
    %c0_i32_1 = arith.constant 0 : i32
    return %c0_i32, %c0_i32_0 : i32, i32
  }
  func.func @transform_3(%arg0: i32) -> (i32, i32) {
    %c0_i32 = arith.constant 0 : i32
    %c0_i32_0 = arith.constant 0 : i32
    %c0_i32_1 = arith.constant 0 : i32
    return %c0_i32, %c0_i32_0 : i32, i32
  }
  func.func @transform_4(%arg0: i32) -> (i32, i32) {
    %c0_i32 = arith.constant 0 : i32
    %c0_i32_0 = arith.constant 0 : i32
    %c0_i32_1 = arith.constant 0 : i32
    return %c0_i32, %c0_i32_0 : i32, i32
  }
  func.func @transform_5(%arg0: i32) -> (i32, i32) {
    %c0_i32 = arith.constant 0 : i32
    %c0_i32_0 = arith.constant 0 : i32
    %c0_i32_1 = arith.constant 0 : i32
    return %c0_i32, %c0_i32_0 : i32, i32
  }
  func.func @transform_6(%arg0: i32) -> (i32, i32) {
    %c0_i32 = arith.constant 0 : i32
    %c0_i32_0 = arith.constant 0 : i32
    %c0_i32_1 = arith.constant 0 : i32
    return %c0_i32, %c0_i32_0 : i32, i32
  }
  func.func @transform_7(%arg0: i32) -> (i32, i32) {
    %c0_i32 = arith.constant 0 : i32
    %c0_i32_0 = arith.constant 0 : i32
    return %arg0, %c0_i32 : i32, i32
  }
  func.func @transform_8(%arg0: i32) -> (i32, i32) {
    %c0_i32 = arith.constant 0 : i32
    %c0_i32_0 = arith.constant 0 : i32
    return %arg0, %c0_i32 : i32, i32
  }
}

module attributes {stable_mosaic.version = 11 : i64} {
  func.func @encoder_kernel(%arg0: i32, %arg1: memref<8x32xf32, #tpu.memory_space<vmem>>, %arg2: memref<32x64xbf16, #tpu.memory_space<vmem>>, %arg3: memref<1x64xf32, #tpu.memory_space<vmem>>, %arg4: memref<64x64xbf16, #tpu.memory_space<vmem>>, %arg5: memref<1x64xf32, #tpu.memory_space<vmem>>, %arg6: memref<64x32xbf16, #tpu.memory_space<vmem>>, %arg7: memref<1x32xf32, #tpu.memory_space<vmem>>, %arg8: memref<8x16xf32, #tpu.memory_space<vmem>>, %arg9: memref<8x16xf32, #tpu.memory_space<vmem>>) attributes {dimension_semantics = [#tpu.dimension_semantics<parallel>], iteration_bounds = array<i64: 1>, scalar_prefetch = 0 : i64, scratch_operands = 0 : i64, tpu.core_type = #tpu.core_type<tc>, window_params = [{transform_indices = @transform_0, window_bounds = array<i64: 8, 32>}, {pipeline_mode = #tpu.pipeline_mode<synchronous>, transform_indices = @transform_1, window_bounds = array<i64: 32, 64>}, {pipeline_mode = #tpu.pipeline_mode<synchronous>, transform_indices = @transform_2, window_bounds = array<i64: 1, 64>}, {pipeline_mode = #tpu.pipeline_mode<synchronous>, transform_indices = @transform_3, window_bounds = array<i64: 64, 64>}, {pipeline_mode = #tpu.pipeline_mode<synchronous>, transform_indices = @transform_4, window_bounds = array<i64: 1, 64>}, {pipeline_mode = #tpu.pipeline_mode<synchronous>, transform_indices = @transform_5, window_bounds = array<i64: 64, 32>}, {pipeline_mode = #tpu.pipeline_mode<synchronous>, transform_indices = @transform_6, window_bounds = array<i64: 1, 32>}, {transform_indices = @transform_7, window_bounds = array<i64: 8, 16>}, {transform_indices = @transform_8, window_bounds = array<i64: 8, 16>}]} {
    %c0 = arith.constant 0 : index
    %c0_0 = arith.constant 0 : index
    %0 = vector.load %arg1[%c0, %c0_0] : memref<8x32xf32, #tpu.memory_space<vmem>>, vector<8x32xf32>
    %1 = arith.truncf %0 : vector<8x32xf32> to vector<8x32xbf16>
    %c0_1 = arith.constant 0 : index
    %c0_2 = arith.constant 0 : index
    %2 = vector.load %arg2[%c0_1, %c0_2] : memref<32x64xbf16, #tpu.memory_space<vmem>>, vector<32x64xbf16>
    %cst = arith.constant dense<0.000000e+00> : vector<8x64xf32>
    %3 = tpu.matmul %1, %2, %cst {dimension_numbers = #tpu.dot_dimension_numbers<[1], [0], [0], [1], [0, 0, 1, 1], [], []>} : vector<8x32xbf16>, vector<32x64xbf16>, vector<8x64xf32> -> vector<8x64xf32>
    %c0_3 = arith.constant 0 : index
    %c0_4 = arith.constant 0 : index
    %4 = vector.load %arg3[%c0_3, %c0_4] : memref<1x64xf32, #tpu.memory_space<vmem>>, vector<1x64xf32>
    %5 = vector.broadcast %4 : vector<1x64xf32> to vector<8x64xf32>
    %6 = arith.addf %3, %5 : vector<8x64xf32>
    %cst_5 = arith.constant 0.000000e+00 : f32
    %7 = vector.broadcast %cst_5 : f32 to vector<8x64xf32>
    %8 = arith.maximumf %6, %7 : vector<8x64xf32>
    %9 = arith.truncf %8 : vector<8x64xf32> to vector<8x64xbf16>
    %c0_6 = arith.constant 0 : index
    %c0_7 = arith.constant 0 : index
    %10 = vector.load %arg4[%c0_6, %c0_7] : memref<64x64xbf16, #tpu.memory_space<vmem>>, vector<64x64xbf16>
    %cst_8 = arith.constant dense<0.000000e+00> : vector<8x64xf32>
    %11 = tpu.matmul %9, %10, %cst_8 {dimension_numbers = #tpu.dot_dimension_numbers<[1], [0], [0], [1], [0, 0, 1, 1], [], []>} : vector<8x64xbf16>, vector<64x64xbf16>, vector<8x64xf32> -> vector<8x64xf32>
    %c0_9 = arith.constant 0 : index
    %c0_10 = arith.constant 0 : index
    %12 = vector.load %arg5[%c0_9, %c0_10] : memref<1x64xf32, #tpu.memory_space<vmem>>, vector<1x64xf32>
    %13 = vector.broadcast %12 : vector<1x64xf32> to vector<8x64xf32>
    %14 = arith.addf %11, %13 : vector<8x64xf32>
    %cst_11 = arith.constant 0.000000e+00 : f32
    %15 = vector.broadcast %cst_11 : f32 to vector<8x64xf32>
    %16 = arith.maximumf %14, %15 : vector<8x64xf32>
    %17 = arith.truncf %16 : vector<8x64xf32> to vector<8x64xbf16>
    %c0_12 = arith.constant 0 : index
    %c0_13 = arith.constant 0 : index
    %18 = vector.load %arg6[%c0_12, %c0_13] : memref<64x32xbf16, #tpu.memory_space<vmem>>, vector<64x32xbf16>
    %cst_14 = arith.constant dense<0.000000e+00> : vector<8x32xf32>
    %19 = tpu.matmul %17, %18, %cst_14 {dimension_numbers = #tpu.dot_dimension_numbers<[1], [0], [0], [1], [0, 0, 1, 1], [], []>} : vector<8x64xbf16>, vector<64x32xbf16>, vector<8x32xf32> -> vector<8x32xf32>
    %c0_15 = arith.constant 0 : index
    %c0_16 = arith.constant 0 : index
    %20 = vector.load %arg7[%c0_15, %c0_16] : memref<1x32xf32, #tpu.memory_space<vmem>>, vector<1x32xf32>
    %21 = vector.broadcast %20 : vector<1x32xf32> to vector<8x32xf32>
    %22 = arith.addf %19, %21 : vector<8x32xf32>
    %23 = vector.extract_strided_slice %22 {offsets = [0, 0], sizes = [8, 16], strides = [1, 1]} : vector<8x32xf32> to vector<8x16xf32>
    %c0_17 = arith.constant 0 : index
    %c0_18 = arith.constant 0 : index
    %24 = vector.load %arg8[%c0_17, %c0_18] : memref<8x16xf32, #tpu.memory_space<vmem>>, vector<8x16xf32>
    tpu.vector_store %arg8[%c0_17, %c0_18], %23 {strides = array<i32>} : memref<8x16xf32, #tpu.memory_space<vmem>>, vector<8x16xf32>,
    %25 = vector.extract_strided_slice %22 {offsets = [0, 16], sizes = [8, 16], strides = [1, 1]} : vector<8x32xf32> to vector<8x16xf32>
    %c0_19 = arith.constant 0 : index
    %c0_20 = arith.constant 0 : index
    %26 = vector.load %arg9[%c0_19, %c0_20] : memref<8x16xf32, #tpu.memory_space<vmem>>, vector<8x16xf32>
    tpu.vector_store %arg9[%c0_19, %c0_20], %25 {strides = array<i32>} : memref<8x16xf32, #tpu.memory_space<vmem>>, vector<8x16xf32>,
    return
  }
  func.func @transform_0(%arg0: i32) -> (i32, i32) {
    %c0_i32 = arith.constant 0 : i32
    %c0_i32_0 = arith.constant 0 : i32
    return %arg0, %c0_i32 : i32, i32
  }
  func.func @transform_1(%arg0: i32) -> (i32, i32) {
    %c0_i32 = arith.constant 0 : i32
    %c0_i32_0 = arith.constant 0 : i32
    %c0_i32_1 = arith.constant 0 : i32
    return %c0_i32, %c0_i32_0 : i32, i32
  }
  func.func @transform_2(%arg0: i32) -> (i32, i32) {
    %c0_i32 = arith.constant 0 : i32
    %c0_i32_0 = arith.constant 0 : i32
    %c0_i32_1 = arith.constant 0 : i32
    return %c0_i32, %c0_i32_0 : i32, i32
  }
  func.func @transform_3(%arg0: i32) -> (i32, i32) {
    %c0_i32 = arith.constant 0 : i32
    %c0_i32_0 = arith.constant 0 : i32
    %c0_i32_1 = arith.constant 0 : i32
    return %c0_i32, %c0_i32_0 : i32, i32
  }
  func.func @transform_4(%arg0: i32) -> (i32, i32) {
    %c0_i32 = arith.constant 0 : i32
    %c0_i32_0 = arith.constant 0 : i32
    %c0_i32_1 = arith.constant 0 : i32
    return %c0_i32, %c0_i32_0 : i32, i32
  }
  func.func @transform_5(%arg0: i32) -> (i32, i32) {
    %c0_i32 = arith.constant 0 : i32
    %c0_i32_0 = arith.constant 0 : i32
    %c0_i32_1 = arith.constant 0 : i32
    return %c0_i32, %c0_i32_0 : i32, i32
  }
  func.func @transform_6(%arg0: i32) -> (i32, i32) {
    %c0_i32 = arith.constant 0 : i32
    %c0_i32_0 = arith.constant 0 : i32
    %c0_i32_1 = arith.constant 0 : i32
    return %c0_i32, %c0_i32_0 : i32, i32
  }
  func.func @transform_7(%arg0: i32) -> (i32, i32) {
    %c0_i32 = arith.constant 0 : i32
    %c0_i32_0 = arith.constant 0 : i32
    return %arg0, %c0_i32 : i32, i32
  }
  func.func @transform_8(%arg0: i32) -> (i32, i32) {
    %c0_i32 = arith.constant 0 : i32
    %c0_i32_0 = arith.constant 0 : i32
    return %arg0, %c0_i32 : i32, i32
  }
}

</mosaic_0001>

<bundles_post_ra>
// kernel: tpu_custom_call.1
= control target key start
LH: loop header
LB: loop body
LE: loop exit
PB: predicated region body
PF: predicated region fallthrough
CT: control target
= control target key end

     0   :  { %14 = vsyncpa [#allocation3], 0  ;;  %s599_s0 = inlined_call_operand.hbm [shape: f32[8,32], index: 0, kind: input, shape index: {}]   ;;  %s600_s1 = inlined_call_operand.vmem [shape: bf16[32,64], index: 1, kind: input, shape index: {}]   ;;  %s601_s2 = inlined_call_operand.vmem [shape: f32[1,64], index: 2, kind: input, shape index: {}]   ;;  %s602_s3 = inlined_call_operand.vmem [shape: bf16[64,64], index: 3, kind: input, shape index: {}]   ;;  %s603_s4 = inlined_call_operand.vmem [shape: f32[1,64], index: 4, kind: input, shape index: {}]   ;;  %s604_s5 = inlined_call_operand.vmem [shape: bf16[64,32], index: 5, kind: input, shape index: {}]   ;;  %s605_s6 = inlined_call_operand.vmem [shape: f32[1,32], index: 6, kind: input, shape index: {}]   ;;  %s606_s7 = inlined_call_operand.hbm [shape: f32[8,16], index: 7, kind: output, shape index: {0}]   ;;  %s607_s8 = inlined_call_operand.hbm [shape: f32[8,16], index: 8, kind: output, shape index: {1}]  }
   0x1   :  { %15 = vsyncpa [#allocation4], 0 }
   0x2   :  { %16 = vsyncpa [#allocation7], 0  ;;  %s466_s27 = smov [#allocation2]   ;;  %s394_s9 = scalar_lea.hbm %s599_s0, 128 }
   0x3   :  { %s23_s28 = sshll.u32 %s466_s27, 4  ;;  %p395_p0 = scmp.ne.s32.totalorder %s599_s0, %s394_s9  ;;  %s24_s28 = int_to_ptr.vmem [resolvable:$true] %s23_s28 }
   0x4   :  { %p398_p1 = scmp.lt.u32.totalorder %s394_s9, %s599_s0 }
   0x6   :  { %p400_p2 = pnand %p398_p1, %p395_p0 }
   0x8   :  { %403 = shalt.err (!%p400_p2)
}
   0x9   :  { %s404_s14 = scalar_lea.vmem %s24_s28, 128  ;;  %p409_p4 = scmp.lt.s32.totalorder %s24_s28, %s24_s28 }
   0xa   :  { %p405_p3 = scmp.ne.s32.totalorder %s24_s28, %s404_s14  ;;  %p410_p5 = scmp.lt.s32.totalorder %s404_s14, %s404_s14 }
   0xc   :  { %p411_p6 = por %p410_p5, %p409_p4 }
   0xe   :  { %p412_p7 = pnand %p411_p6, %p405_p3 }
  0x10   :  { %415 = shalt.err (!%p412_p7)
}
  0x11   :  { %26 = dma.hbm_to_vmem [thread:$0]  %s599_s0, 128, %s24_s28, [#allocation3]  }
  0x12   :  { %460 = dma.done.wait [#allocation3], 128  }
  0x13   :  { %461 = vsyncadd [#allocation3], 4294967168  ;;  %v467_v0 = vmov 0.0   ;;  %vm468_vm0 = vmmov 0   ;;  %v384_v1 = vld [vmem:[%s600_s1] sm:$0xff]   ;;  %v385_v2 = vld [vmem:[%s600_s1 + $0x8] sm:$0xff]  }
  0x14   :  { %346 = vmatprep.subr.bf16.mxu0 %v467_v0  ;;  %350 = vmatprep.mubr.msk.bf16.mxu0 %vm468_vm0, %v467_v0  ;;  %v43_v3 = vld [vmem:[#allocation2] sm:$0xff]  ;;  %vm68_vm1 = vcmask 261120   ;;  %v387_v5 = vld [vmem:[%s602_s3 + $0x8] sm:$0xff]   ;;  %v388_v7 = vld [vmem:[%s602_s3 + $0x10] sm:$0xff]   ;;  %vm153_vm2 = vcmask 523264   ;;  %s469_s17 = smov [#allocation5]  }
  0x15   :  { %354 = vmatprep.subr.bf16.mxu1 %v467_v0  ;;  %362 = vmatprep.mubr.msk.bf16.mxu1 %vm468_vm0, %v467_v0  ;;  %v386_v4 = vld [vmem:[%s602_s3] sm:$0xff]   ;;  %v44_v6 = vpack.c.bf16 %v43_v3, %v43_v3  ;;  %v389_v8 = vld [vmem:[%s602_s3 + $0x18] sm:$0xff]   ;;  %v391_v10 = vld [vmem:[%s604_s5 + $0x8] sm:$0xff]   ;;  %vm281_vm3 = vcmask 130048  }
  0x16   :  { %347 = vmatpush3.bf16.msra.mxu0 %v384_v1  ;;  %355 = vmatpush3.bf16.msra.mxu1 %v386_v4  ;;  %v390_v9 = vld [vmem:[%s604_s5] sm:$0xff]   ;;  %v392_v19 = vld [vmem:[%s604_s5 + $0x10] sm:$0xff]   ;;  %v393_v20 = vld [vmem:[%s604_s5 + $0x18] sm:$0xff]   ;;  %s294_s5 = sshll.u32 %s469_s17, 4  ;;  %s295_s5 = int_to_ptr.vmem [resolvable:$true] %s294_s5 }
  0x17   :  { %348 = vmatprep.subr.bf16.mxu0 %v467_v0  ;;  %356 = vmatprep.subr.bf16.mxu1 %v467_v0  ;;  %v317_v11 = vld [vmem:[%s601_s2] ss:$0 sm:$0xff]  ;;  %s416_s18 = scalar_lea.vmem %s295_s5, 128  ;;  %p421_p9 = scmp.lt.s32.totalorder %s295_s5, %s295_s5 }
  0x18   :  { %v321_v21 = vld [vmem:[%s603_s4] ss:$0 sm:$0xff]  ;;  %s470_s4 = smov 112   ;;  %p417_p8 = scmp.ne.s32.totalorder %s295_s5, %s416_s18 }
  0x19   :  { %v327_v29 = vld [vmem:[%s605_s6] ss:$0 sm:$0xff]  ;;  %p422_p10 = scmp.lt.s32.totalorder %s416_s18, %s416_s18 }
  0x1a   :  { %349 = vmatpush3.bf16.msra.mxu0 %v385_v2  ;;  %357 = vmatpush3.bf16.msra.mxu1 %v387_v5 }
  0x1b   :  { %366 = vmatprep.subr.bf16.mxu0 %v467_v0  ;;  %358 = vmatprep.subr.bf16.mxu1 %v467_v0  ;;  %p423_p11 = por %p422_p10, %p421_p9 }
  0x1d   :  { %351 = vmatmul.mubr.msk.bf16.vlgmr.msra.gmra.mrb[0].mxu0 %vm68_vm1, %v44_v6  ;;  %p424_p12 = pnand %p423_p11, %p417_p8 }
  0x1e   :  { %374 = vmatprep.mubr.msk.bf16.mxu0 %vm468_vm0, %v467_v0  ;;  %359 = vmatpush3.bf16.msra.mxu1 %v388_v7 }
  0x1f   :  { %360 = vmatprep.subr.bf16.mxu1 %v467_v0  ;;  %367 = vmatpush3.bf16.msra.mxu0 %v390_v9 }
  0x20   :  { %368 = vmatprep.subr.bf16.mxu0 %v467_v0 }
  0x22   :  { %361 = vmatpush3.bf16.msra.mxu1 %v389_v8 }
  0x23   :  { %369 = vmatpush3.bf16.msra.mxu0 %v391_v10 }
  0x24   :  { %370 = vmatprep.subr.bf16.mxu0 %v467_v0 }
  0x27   :  { %371 = vmatpush3.bf16.msra.mxu0 %v392_v19 }
  0x28   :  { %372 = vmatprep.subr.bf16.mxu0 %v467_v0 }
  0x2b   :  { %373 = vmatpush3.bf16.msra.mxu0 %v393_v20 }
  0xf0   :  { %v106_v12 = vpop.f32.mrb[0].mxu0 }
  0xf1   :  { %v107_v13 = vadd.f32 %v317_v11, %v106_v12  ;;  %v352_v14 = vpop.f32.mrb[1].mxu0 }
  0xf2   :  { %v109_v15 = vpop.f32.mrb[2].mxu0 }
  0xf3   :  { %v112_v16 = vmax.f32 %v107_v13, 0.0  ;;  %v353_v17 = vpop.f32.mrb[3].mxu0 }
  0xf5   :  { %v113_v18 = vpack.c.bf16 %v112_v16, %v112_v16 }
  0xf7   :  { %363 = vmatmul.mubr.msk.bf16.vlgmr.msra.gmra.mrb[0].mxu1 %vm153_vm2, %v113_v18 }
 0x1ca   :  { %v191_v22 = vpop.f32.mrb[0].mxu1 }
 0x1cb   :  { %v192_v23 = vadd.f32 %v321_v21, %v191_v22  ;;  %v364_v24 = vpop.f32.mrb[1].mxu1 }
 0x1cc   :  { %v194_v25 = vpop.f32.mrb[2].mxu1 }
 0x1cd   :  { %v197_v26 = vmax.f32 %v192_v23, 0.0  ;;  %v365_v27 = vpop.f32.mrb[3].mxu1 }
 0x1cf   :  { %v198_v28 = vpack.c.bf16 %v197_v26, %v197_v26 }
 0x1d1   :  { %375 = vmatmul.mubr.msk.bf16.vlgmr.msra.gmra.mrb[4].mxu0 %vm153_vm2, %v198_v28 }
 0x2a4   :  { %v275_v30 = vpop.f32.mrb[4].mxu0 }
 0x2a5   :  { %v276_v31 = vadd.f32 %v327_v29, %v275_v30  ;;  %v376_v32 = vpop.f32.mrb[5].mxu0 }
 0x2a6   :  { %v278_v33 = vpop.f32.mrb[6].mxu0 }
 0x2a7   :  { %v377_v34 = vpop.f32.mrb[7].mxu0  ;;  %284 = vrot.lane.b32.xlu0 %v276_v31, %s470_s4  ;;  %282 = vst.msk [vmem:[#allocation5] sm:$0xff] %vm281_vm3, %v276_v31 }
 0x2a8   :  { %427 = shalt.err (!%p424_p12)
}
 0x2a9   :  { %s428_s20 = scalar_lea.hbm %s606_s7, 128 }
 0x2aa   :  { %p429_p13 = scmp.ne.s32.totalorder %s606_s7, %s428_s20  ;;  %p432_p0 = scmp.lt.u32.totalorder %s428_s20, %s606_s7 }
 0x2ac   :  { %p434_p1 = pnand %p432_p0, %p429_p13 }
 0x2ae   :  { %437 = shalt.err (!%p434_p1)
}
 0x2af   :  { %297 = dma.vmem_to_hbm [thread:$0]  %s295_s5, 128, %s606_s7, [#allocation4]  }
 0x2b0   :  { %s471_s25 = smov [#allocation6]  }
 0x2b1   :  { %s304_s26 = sshll.u32 %s471_s25, 4  ;;  %s305_s26 = int_to_ptr.vmem [resolvable:$true] %s304_s26 }
 0x2b2   :  { %s438_s27 = scalar_lea.vmem %s305_s26, 128  ;;  %p443_p3 = scmp.lt.s32.totalorder %s305_s26, %s305_s26 }
 0x2b3   :  { %p439_p2 = scmp.ne.s32.totalorder %s305_s26, %s438_s27  ;;  %p444_p4 = scmp.lt.s32.totalorder %s438_s27, %s438_s27 }
 0x2b5   :  { %p445_p5 = por %p444_p4, %p443_p3 }
 0x2b7   :  { %p446_p6 = pnand %p445_p5, %p439_p2 }
 0x319   :  { %v285_v35 = vpop.permute.xlu0 %284 }
 0x31a   :  { %287 = vst.msk [vmem:[#allocation6] sm:$0xff] %vm281_vm3, %v285_v35 }
 0x31b   :  { %449 = shalt.err (!%p446_p6)
}
 0x31c   :  { %s450_s30 = scalar_lea.hbm %s607_s8, 128 }
 0x31d   :  { %p451_p7 = scmp.ne.s32.totalorder %s607_s8, %s450_s30  ;;  %p454_p8 = scmp.lt.u32.totalorder %s450_s30, %s607_s8 }
 0x31f   :  { %p456_p9 = pnand %p454_p8, %p451_p7 }
 0x321   :  { %459 = shalt.err (!%p456_p9)
}
 0x322   :  { %307 = dma.vmem_to_hbm [thread:$0]  %s305_s26, 128, %s607_s8, [#allocation7]  }
 0x323   :  { %462 = dma.done.wait [#allocation4], 128  }
 0x324   :  { %463 = vsyncadd [#allocation4], 4294967168 }
 0x325   :  { %464 = dma.done.wait [#allocation7], 128  }
 0x326   :  { %465 = vsyncadd [#allocation7], 4294967168 }
 0x327   :  { %314 = vsyncpa [#allocation3], 1 }
 0x328   :  { %315 = vsyncpa [#allocation4], 1 }
 0x329   :  { %316 = vsyncpa [#allocation7], 1 }

// kernel: tpu_custom_call.1
= control target key start
LH: loop header
LB: loop body
LE: loop exit
PB: predicated region body
PF: predicated region fallthrough
CT: control target
= control target key end

     0   :  { %14 = vsyncpa [#allocation3], 0  ;;  %s599_s0 = inlined_call_operand.hbm [shape: f32[8,32], index: 0, kind: input, shape index: {}]   ;;  %s600_s1 = inlined_call_operand.vmem [shape: bf16[32,64], index: 1, kind: input, shape index: {}]   ;;  %s601_s2 = inlined_call_operand.vmem [shape: f32[1,64], index: 2, kind: input, shape index: {}]   ;;  %s602_s3 = inlined_call_operand.vmem [shape: bf16[64,64], index: 3, kind: input, shape index: {}]   ;;  %s603_s4 = inlined_call_operand.vmem [shape: f32[1,64], index: 4, kind: input, shape index: {}]   ;;  %s604_s5 = inlined_call_operand.vmem [shape: bf16[64,32], index: 5, kind: input, shape index: {}]   ;;  %s605_s6 = inlined_call_operand.vmem [shape: f32[1,32], index: 6, kind: input, shape index: {}]   ;;  %s606_s7 = inlined_call_operand.hbm [shape: f32[8,16], index: 7, kind: output, shape index: {0}]   ;;  %s607_s8 = inlined_call_operand.hbm [shape: f32[8,16], index: 8, kind: output, shape index: {1}]  }
   0x1   :  { %15 = vsyncpa [#allocation4], 0 }
   0x2   :  { %16 = vsyncpa [#allocation7], 0  ;;  %s466_s27 = smov [#allocation2]   ;;  %s394_s9 = scalar_lea.hbm %s599_s0, 128 }
   0x3   :  { %s23_s28 = sshll.u32 %s466_s27, 4  ;;  %p395_p0 = scmp.ne.s32.totalorder %s599_s0, %s394_s9  ;;  %s24_s28 = int_to_ptr.vmem [resolvable:$true] %s23_s28 }
   0x4   :  { %p398_p1 = scmp.lt.u32.totalorder %s394_s9, %s599_s0 }
   0x6   :  { %p400_p2 = pnand %p398_p1, %p395_p0 }
   0x8   :  { %403 = shalt.err (!%p400_p2)
}
   0x9   :  { %s404_s14 = scalar_lea.vmem %s24_s28, 128  ;;  %p409_p4 = scmp.lt.s32.totalorder %s24_s28, %s24_s28 }
   0xa   :  { %p405_p3 = scmp.ne.s32.totalorder %s24_s28, %s404_s14  ;;  %p410_p5 = scmp.lt.s32.totalorder %s404_s14, %s404_s14 }
   0xc   :  { %p411_p6 = por %p410_p5, %p409_p4 }
   0xe   :  { %p412_p7 = pnand %p411_p6, %p405_p3 }
  0x10   :  { %415 = shalt.err (!%p412_p7)
}
  0x11   :  { %26 = dma.hbm_to_vmem [thread:$0]  %s599_s0, 128, %s24_s28, [#allocation3]  }
  0x12   :  { %460 = dma.done.wait [#allocation3], 128  }
  0x13   :  { %461 = vsyncadd [#allocation3], 4294967168  ;;  %v467_v0 = vmov 0.0   ;;  %vm468_vm0 = vmmov 0   ;;  %v384_v1 = vld [vmem:[%s600_s1] sm:$0xff]   ;;  %v385_v2 = vld [vmem:[%s600_s1 + $0x8] sm:$0xff]  }
  0x14   :  { %346 = vmatprep.subr.bf16.mxu0 %v467_v0  ;;  %350 = vmatprep.mubr.msk.bf16.mxu0 %vm468_vm0, %v467_v0  ;;  %v43_v3 = vld [vmem:[#allocation2] sm:$0xff]  ;;  %vm68_vm1 = vcmask 261120   ;;  %v387_v5 = vld [vmem:[%s602_s3 + $0x8] sm:$0xff]   ;;  %v388_v7 = vld [vmem:[%s602_s3 + $0x10] sm:$0xff]   ;;  %vm153_vm2 = vcmask 523264   ;;  %s469_s17 = smov [#allocation5]  }
  0x15   :  { %354 = vmatprep.subr.bf16.mxu1 %v467_v0  ;;  %362 = vmatprep.mubr.msk.bf16.mxu1 %vm468_vm0, %v467_v0  ;;  %v386_v4 = vld [vmem:[%s602_s3] sm:$0xff]   ;;  %v44_v6 = vpack.c.bf16 %v43_v3, %v43_v3  ;;  %v389_v8 = vld [vmem:[%s602_s3 + $0x18] sm:$0xff]   ;;  %v391_v10 = vld [vmem:[%s604_s5 + $0x8] sm:$0xff]   ;;  %vm281_vm3 = vcmask 130048  }
  0x16   :  { %347 = vmatpush3.bf16.msra.mxu0 %v384_v1  ;;  %355 = vmatpush3.bf16.msra.mxu1 %v386_v4  ;;  %v390_v9 = vld [vmem:[%s604_s5] sm:$0xff]   ;;  %v392_v19 = vld [vmem:[%s604_s5 + $0x10] sm:$0xff]   ;;  %v393_v20 = vld [vmem:[%s604_s5 + $0x18] sm:$0xff]   ;;  %s294_s5 = sshll.u32 %s469_s17, 4  ;;  %s295_s5 = int_to_ptr.vmem [resolvable:$true] %s294_s5 }
  0x17   :  { %348 = vmatprep.subr.bf16.mxu0 %v467_v0  ;;  %356 = vmatprep.subr.bf16.mxu1 %v467_v0  ;;  %v317_v11 = vld [vmem:[%s601_s2] ss:$0 sm:$0xff]  ;;  %s416_s18 = scalar_lea.vmem %s295_s5, 128  ;;  %p421_p9 = scmp.lt.s32.totalorder %s295_s5, %s295_s5 }
  0x18   :  { %v321_v21 = vld [vmem:[%s603_s4] ss:$0 sm:$0xff]  ;;  %s470_s4 = smov 112   ;;  %p417_p8 = scmp.ne.s32.totalorder %s295_s5, %s416_s18 }
  0x19   :  { %v327_v29 = vld [vmem:[%s605_s6] ss:$0 sm:$0xff]  ;;  %p422_p10 = scmp.lt.s32.totalorder %s416_s18, %s416_s18 }
  0x1a   :  { %349 = vmatpush3.bf16.msra.mxu0 %v385_v2  ;;  %357 = vmatpush3.bf16.msra.mxu1 %v387_v5 }
  0x1b   :  { %366 = vmatprep.subr.bf16.mxu0 %v467_v0  ;;  %358 = vmatprep.subr.bf16.mxu1 %v467_v0  ;;  %p423_p11 = por %p422_p10, %p421_p9 }
  0x1d   :  { %351 = vmatmul.mubr.msk.bf16.vlgmr.msra.gmra.mrb[0].mxu0 %vm68_vm1, %v44_v6  ;;  %p424_p12 = pnand %p423_p11, %p417_p8 }
  0x1e   :  { %374 = vmatprep.mubr.msk.bf16.mxu0 %vm468_vm0, %v467_v0  ;;  %359 = vmatpush3.bf16.msra.mxu1 %v388_v7 }
  0x1f   :  { %360 = vmatprep.subr.bf16.mxu1 %v467_v0  ;;  %367 = vmatpush3.bf16.msra.mxu0 %v390_v9 }
  0x20   :  { %368 = vmatprep.subr.bf16.mxu0 %v467_v0 }
  0x22   :  { %361 = vmatpush3.bf16.msra.mxu1 %v389_v8 }
  0x23   :  { %369 = vmatpush3.bf16.msra.mxu0 %v391_v10 }
  0x24   :  { %370 = vmatprep.subr.bf16.mxu0 %v467_v0 }
  0x27   :  { %371 = vmatpush3.bf16.msra.mxu0 %v392_v19 }
  0x28   :  { %372 = vmatprep.subr.bf16.mxu0 %v467_v0 }
  0x2b   :  { %373 = vmatpush3.bf16.msra.mxu0 %v393_v20 }
  0xf0   :  { %v106_v12 = vpop.f32.mrb[0].mxu0 }
  0xf1   :  { %v107_v13 = vadd.f32 %v317_v11, %v106_v12  ;;  %v352_v14 = vpop.f32.mrb[1].mxu0 }
  0xf2   :  { %v109_v15 = vpop.f32.mrb[2].mxu0 }
  0xf3   :  { %v112_v16 = vmax.f32 %v107_v13, 0.0  ;;  %v353_v17 = vpop.f32.mrb[3].mxu0 }
  0xf5   :  { %v113_v18 = vpack.c.bf16 %v112_v16, %v112_v16 }
  0xf7   :  { %363 = vmatmul.mubr.msk.bf16.vlgmr.msra.gmra.mrb[0].mxu1 %vm153_vm2, %v113_v18 }
 0x1ca   :  { %v191_v22 = vpop.f32.mrb[0].mxu1 }
 0x1cb   :  { %v192_v23 = vadd.f32 %v321_v21, %v191_v22  ;;  %v364_v24 = vpop.f32.mrb[1].mxu1 }
 0x1cc   :  { %v194_v25 = vpop.f32.mrb[2].mxu1 }
 0x1cd   :  { %v197_v26 = vmax.f32 %v192_v23, 0.0  ;;  %v365_v27 = vpop.f32.mrb[3].mxu1 }
 0x1cf   :  { %v198_v28 = vpack.c.bf16 %v197_v26, %v197_v26 }
 0x1d1   :  { %375 = vmatmul.mubr.msk.bf16.vlgmr.msra.gmra.mrb[4].mxu0 %vm153_vm2, %v198_v28 }
 0x2a4   :  { %v275_v30 = vpop.f32.mrb[4].mxu0 }
 0x2a5   :  { %v276_v31 = vadd.f32 %v327_v29, %v275_v30  ;;  %v376_v32 = vpop.f32.mrb[5].mxu0 }
 0x2a6   :  { %v278_v33 = vpop.f32.mrb[6].mxu0 }
 0x2a7   :  { %v377_v34 = vpop.f32.mrb[7].mxu0  ;;  %284 = vrot.lane.b32.xlu0 %v276_v31, %s470_s4  ;;  %282 = vst.msk [vmem:[#allocation5] sm:$0xff] %vm281_vm3, %v276_v31 }
 0x2a8   :  { %427 = shalt.err (!%p424_p12)
}
 0x2a9   :  { %s428_s20 = scalar_lea.hbm %s606_s7, 128 }
 0x2aa   :  { %p429_p13 = scmp.ne.s32.totalorder %s606_s7, %s428_s20  ;;  %p432_p0 = scmp.lt.u32.totalorder %s428_s20, %s606_s7 }
 0x2ac   :  { %p434_p1 = pnand %p432_p0, %p429_p13 }
 0x2ae   :  { %437 = shalt.err (!%p434_p1)
}
 0x2af   :  { %297 = dma.vmem_to_hbm [thread:$0]  %s295_s5, 128, %s606_s7, [#allocation4]  }
 0x2b0   :  { %s471_s25 = smov [#allocation6]  }
 0x2b1   :  { %s304_s26 = sshll.u32 %s471_s25, 4  ;;  %s305_s26 = int_to_ptr.vmem [resolvable:$true] %s304_s26 }
 0x2b2   :  { %s438_s27 = scalar_lea.vmem %s305_s26, 128  ;;  %p443_p3 = scmp.lt.s32.totalorder %s305_s26, %s305_s26 }
 0x2b3   :  { %p439_p2 = scmp.ne.s32.totalorder %s305_s26, %s438_s27  ;;  %p444_p4 = scmp.lt.s32.totalorder %s438_s27, %s438_s27 }
 0x2b5   :  { %p445_p5 = por %p444_p4, %p443_p3 }
 0x2b7   :  { %p446_p6 = pnand %p445_p5, %p439_p2 }
 0x319   :  { %v285_v35 = vpop.permute.xlu0 %284 }
 0x31a   :  { %287 = vst.msk [vmem:[#allocation6] sm:$0xff] %vm281_vm3, %v285_v35 }
 0x31b   :  { %449 = shalt.err (!%p446_p6)
}
 0x31c   :  { %s450_s30 = scalar_lea.hbm %s607_s8, 128 }
 0x31d   :  { %p451_p7 = scmp.ne.s32.totalorder %s607_s8, %s450_s30  ;;  %p454_p8 = scmp.lt.u32.totalorder %s450_s30, %s607_s8 }
 0x31f   :  { %p456_p9 = pnand %p454_p8, %p451_p7 }
 0x321   :  { %459 = shalt.err (!%p456_p9)
}
 0x322   :  { %307 = dma.vmem_to_hbm [thread:$0]  %s305_s26, 128, %s607_s8, [#allocation7]  }
 0x323   :  { %462 = dma.done.wait [#allocation4], 128  }
 0x324   :  { %463 = vsyncadd [#allocation4], 4294967168 }
 0x325   :  { %464 = dma.done.wait [#allocation7], 128  }
 0x326   :  { %465 = vsyncadd [#allocation7], 4294967168 }
 0x327   :  { %314 = vsyncpa [#allocation3], 1 }
 0x328   :  { %315 = vsyncpa [#allocation4], 1 }
 0x329   :  { %316 = vsyncpa [#allocation7], 1 }

</bundles_post_ra>
